<compile_context>
chip_gen: v6e
topology: v6e:2x2x1
jax: 0.10.0
libtpu: 0.0.40
codegen_flags: <defaults>
</compile_context>

<pallas_src>
import jax
import jax.numpy as jnp
from jax.experimental import pallas as pl
from jax.experimental.pallas import tpu as pltpu


def _residual_block_kernel(xp_ref, w1_ref, b1_ref, w2_ref, b2_ref, o_ref):
    # xp_ref: (Nb, Cin, L+4)   input, padded by 2 along L (halo for both convs)
    # w1_ref: (Cout, K*Cin)    conv1 weights, BN1 folded   (compute dtype)
    # b1_ref: (Cout, 1)        folded bias (f32)
    # w2_ref: (Cout, K*Cout)   conv2 weights, BN2 folded   (compute dtype)
    # b2_ref: (Cout, 1)        folded bias (f32)
    # o_ref : (Nb, Cout, L)
    nb = xp_ref.shape[0]
    Cout, L = o_ref.shape[1], o_ref.shape[2]

    W1 = w1_ref[...]                    # (Cout, 3*Cin)
    W2 = w2_ref[...]                    # (Cout, 3*Cout)
    b1 = b1_ref[...]                    # (Cout, 1) f32
    b2 = b2_ref[...]                    # (Cout, 1) f32
    cdt = W2.dtype                      # compute dtype (bf16 or f32)

    # conv1 is computed on an extended domain of L+2 columns; columns 0 and L+1
    # are conv2's zero padding, so mask them.  Built once per step (hoisted out
    # of the per-element loop).
    col = jax.lax.broadcasted_iota(jnp.int32, (Cout, L + 2), 1)
    interior = (col >= 1) & (col <= L)

    for b in range(nb):                 # static unroll over the batch block
        xpb = xp_ref[b]                 # (Cin, L+4)

        # ---- conv1 (+ folded BN1) as ONE matmul: stack the 3 shifted copies
        # along sublanes -> contraction depth 3*Cin.
        x1 = jnp.concatenate(
            [xpb[:, 0:L + 2], xpb[:, 1:L + 3], xpb[:, 2:L + 4]], axis=0)
        acc1 = jnp.dot(W1, x1, preferred_element_type=jnp.float32)  # (Cout, L+2)
        h = jnp.where(interior, jnp.maximum(acc1 + b1, 0.0), 0.0)   # f32
        hc = h.astype(cdt)

        # ---- conv2 (+ folded BN2) as ONE matmul, contraction 3*Cout.
        x2 = jnp.concatenate(
            [hc[:, 0:L], hc[:, 1:L + 1], hc[:, 2:L + 2]], axis=0)
        acc2 = jnp.dot(W2, x2, preferred_element_type=jnp.float32)  # (Cout, L)

        # ---- residual add (identity skip: stride=1, downsample=None) + ReLU
        res = xpb[:, 2:L + 2].astype(jnp.float32)
        o_ref[b] = jnp.maximum(acc2 + b2 + res, 0.0).astype(o_ref.dtype)


def _fold_conv_bn(w, b, gamma, beta, mean, var, eps=1e-5):
    """Fold eval-mode BatchNorm1d into the preceding Conv1d weights/bias."""
    s = gamma / jnp.sqrt(var + eps)             # (Cout,)
    w_f = w * s[:, None, None]                  # (Cout, Cin, K)
    b_f = (b - mean) * s + beta                 # (Cout,)
    return w_f, b_f


def residual_block(x, w1, b1, bn1, w2, b2, bn2, eps=1e-5,
                   compute_dtype=jnp.bfloat16, batch_block=None):
    """x: (N, C, L) f32; w*: (C, C, 3); b*: (C,); bn* = (gamma, beta, mean, var).
    Returns (N, C, L) f32, matching ResidualBlock.forward (stride=1,
    downsample=None, BatchNorm in eval mode)."""
    N, Cin, L = x.shape
    Cout, _, K = w1.shape
    assert Cin == Cout, "identity residual requires in_channels == out_channels"
    assert L % 128 == 0, "demo wrapper keeps L a multiple of 128 for lane-dense I/O"

    # Batch block: amortize per-step overhead, but keep >=2 grid steps when
    # possible so both v7x TensorCores are fed (v5e/v6e: 1 TC, costs nothing).
    if batch_block is None:
        batch_block = min(8, max(1, N // 2))
    while N % batch_block:
        batch_block -= 1
    nb = batch_block

    w1f, b1f = _fold_conv_bn(w1, b1, *bn1, eps)
    w2f, b2f = _fold_conv_bn(w2, b2, *bn2, eps)

    # (Cout, Cin, K) -> (Cout, K*Cin) so that row block k of the sublane-stacked
    # RHS (shift-k copy) contracts against the k-th tap.  Lane-dense weight block.
    w1s = jnp.transpose(w1f, (0, 2, 1)).reshape(Cout, K * Cin).astype(compute_dtype)
    w2s = jnp.transpose(w2f, (0, 2, 1)).reshape(Cout, K * Cout).astype(compute_dtype)
    b1c = b1f[:, None].astype(jnp.float32)
    b2c = b2f[:, None].astype(jnp.float32)

    xp = jnp.pad(x, ((0, 0), (0, 0), (2, 2))).astype(compute_dtype)  # halo of 2

    return pl.pallas_call(
        _residual_block_kernel,
        out_shape=jax.ShapeDtypeStruct((N, Cout, L), x.dtype),
        grid=(N // nb,),
        in_specs=[
            pl.BlockSpec((nb, Cin, L + 4), lambda n: (n, 0, 0)),
            pl.BlockSpec((Cout, K * Cin), lambda n: (0, 0)),
            pl.BlockSpec((Cout, 1), lambda n: (0, 0)),
            pl.BlockSpec((Cout, K * Cout), lambda n: (0, 0)),
            pl.BlockSpec((Cout, 1), lambda n: (0, 0)),
        ],
        out_specs=pl.BlockSpec((nb, Cout, L), lambda n: (n, 0, 0)),
        compiler_params=pltpu.CompilerParams(dimension_semantics=("parallel",)),
    )(xp, w1s, b1c, w2s, b2c)


def _reference(x, w1, b1, bn1, w2, b2, bn2, eps=1e-5):
    """Pure-JAX f32 reference mirroring the PyTorch module in eval mode."""
    def conv_bn(z, w, b, bn):
        g, be, m, v = bn
        y = jax.lax.conv_general_dilated(
            z, w, window_strides=(1,), padding=[(1, 1)],
            dimension_numbers=("NCH", "OIH", "NCH"))
        y = y + b[None, :, None]
        return (g[None, :, None] * (y - m[None, :, None])
                / jnp.sqrt(v + eps)[None, :, None] + be[None, :, None])

    h = jnp.maximum(conv_bn(x, w1, b1, bn1), 0.0)
    y = conv_bn(h, w2, b2, bn2)
    return jnp.maximum(y + x, 0.0)


if __name__ == "__main__":
    # ResidualBlock(in_channels=32, out_channels=32, stride=1, downsample=None)
    N, C, L, K = 2, 32, 256, 3
    eps = 1e-5

    keys = jax.random.split(jax.random.PRNGKey(0), 13)
    bound = 1.0 / (C * K) ** 0.5                # PyTorch Conv1d default init bound

    w1 = jax.random.uniform(keys[0], (C, C, K), jnp.float32, -bound, bound)
    b1 = jax.random.uniform(keys[1], (C,), jnp.float32, -bound, bound)
    g1 = jax.random.uniform(keys[2], (C,), jnp.float32, 0.5, 1.5)
    be1 = jax.random.uniform(keys[3], (C,), jnp.float32, -0.5, 0.5)
    m1 = 0.1 * jax.random.normal(keys[4], (C,), jnp.float32)
    v1 = jax.random.uniform(keys[5], (C,), jnp.float32, 0.5, 1.5)

    w2 = jax.random.uniform(keys[6], (C, C, K), jnp.float32, -bound, bound)
    b2 = jax.random.uniform(keys[7], (C,), jnp.float32, -bound, bound)
    g2 = jax.random.uniform(keys[8], (C,), jnp.float32, 0.5, 1.5)
    be2 = jax.random.uniform(keys[9], (C,), jnp.float32, -0.5, 0.5)
    m2 = 0.1 * jax.random.normal(keys[10], (C,), jnp.float32)
    v2 = jax.random.uniform(keys[11], (C,), jnp.float32, 0.5, 1.5)

    x = jax.random.normal(keys[12], (N, C, L), jnp.float32)

    bn1 = (g1, be1, m1, v1)
    bn2 = (g2, be2, m2, v2)

    # Optimized bf16-operand path (f32 accumulation + f32 epilogue).
    out = residual_block(x, w1, b1, bn1, w2, b2, bn2, eps,
                         compute_dtype=jnp.bfloat16)
    out = jax.block_until_ready(out)

    ref = _reference(x, w1, b1, bn1, w2, b2, bn2, eps)
    assert out.shape == ref.shape == (N, C, L)

    # Tight structural check: run the same kernel with f32 operands.
    out_f32 = residual_block(x, w1, b1, bn1, w2, b2, bn2, eps,
                             compute_dtype=jnp.float32)
    out_f32 = jax.block_until_ready(out_f32)
    err_f32 = float(jnp.max(jnp.abs(out_f32 - ref)))
    assert jnp.allclose(out_f32, ref, atol=1e-3, rtol=1e-3), \
        f"f32 path max abs err {err_f32}"

    # bf16 path: operands are quantized to bf16 (folded BN scales amplify the
    # weight quantization), so only a looser sanity tolerance applies.
    err_bf16 = float(jnp.max(jnp.abs(out - ref)))
    assert jnp.allclose(out, ref, atol=5e-2, rtol=5e-2), \
        f"bf16 path max abs err {err_bf16}"

    print("KERNEL_OK")
</pallas_src>

<mosaic_0001>
module attributes {stable_mosaic.version = 11 : i64} {
  func.func @_residual_block_kernel(%arg0: i32, %arg1: memref<1x32x260xbf16, #tpu.memory_space<vmem>>, %arg2: memref<32x96xbf16, #tpu.memory_space<vmem>>, %arg3: memref<32x1xf32, #tpu.memory_space<vmem>>, %arg4: memref<32x96xbf16, #tpu.memory_space<vmem>>, %arg5: memref<32x1xf32, #tpu.memory_space<vmem>>, %arg6: memref<1x32x256xf32, #tpu.memory_space<vmem>>) attributes {dimension_semantics = [#tpu.dimension_semantics<parallel>], iteration_bounds = array<i64: 2>, scalar_prefetch = 0 : i64, scratch_operands = 0 : i64, tpu.core_type = #tpu.core_type<tc>, window_params = [{transform_indices = @transform_0, window_bounds = array<i64: 1, 32, 260>}, {pipeline_mode = #tpu.pipeline_mode<synchronous>, transform_indices = @transform_1, window_bounds = array<i64: 32, 96>}, {pipeline_mode = #tpu.pipeline_mode<synchronous>, transform_indices = @transform_2, window_bounds = array<i64: 32, 1>}, {pipeline_mode = #tpu.pipeline_mode<synchronous>, transform_indices = @transform_3, window_bounds = array<i64: 32, 96>}, {pipeline_mode = #tpu.pipeline_mode<synchronous>, transform_indices = @transform_4, window_bounds = array<i64: 32, 1>}, {transform_indices = @transform_5, window_bounds = array<i64: 1, 32, 256>}]} {
    %c0 = arith.constant 0 : index
    %c0_0 = arith.constant 0 : index
    %0 = vector.load %arg2[%c0, %c0_0] : memref<32x96xbf16, #tpu.memory_space<vmem>>, vector<32x96xbf16>
    %c0_1 = arith.constant 0 : index
    %c0_2 = arith.constant 0 : index
    %1 = vector.load %arg4[%c0_1, %c0_2] : memref<32x96xbf16, #tpu.memory_space<vmem>>, vector<32x96xbf16>
    %c0_3 = arith.constant 0 : index
    %c0_4 = arith.constant 0 : index
    %2 = vector.load %arg3[%c0_3, %c0_4] : memref<32x1xf32, #tpu.memory_space<vmem>>, vector<32x1xf32>
    %c0_5 = arith.constant 0 : index
    %c0_6 = arith.constant 0 : index
    %3 = vector.load %arg5[%c0_5, %c0_6] : memref<32x1xf32, #tpu.memory_space<vmem>>, vector<32x1xf32>
    %4 = tpu.iota {dimensions = array<i32: 1>} : vector<32x258xi32>
    %c1_i32 = arith.constant 1 : i32
    %5 = vector.broadcast %c1_i32 : i32 to vector<32x258xi32>
    %6 = arith.cmpi sge, %4, %5 : vector<32x258xi32>
    %c256_i32 = arith.constant 256 : i32
    %7 = vector.broadcast %c256_i32 : i32 to vector<32x258xi32>
    %8 = arith.cmpi sle, %4, %7 : vector<32x258xi32>
    %9 = arith.andi %6, %8 : vector<32x258xi1>
    %c0_7 = arith.constant 0 : index
    %c0_8 = arith.constant 0 : index
    %c0_9 = arith.constant 0 : index
    %10 = vector.load %arg1[%c0_7, %c0_8, %c0_9] : memref<1x32x260xbf16, #tpu.memory_space<vmem>>, vector<1x32x260xbf16>
    %11 = vector.shape_cast %10 : vector<1x32x260xbf16> to vector<32x260xbf16>
    %12 = vector.extract_strided_slice %11 {offsets = [0, 0], sizes = [32, 258], strides = [1, 1]} : vector<32x260xbf16> to vector<32x258xbf16>
    %13 = vector.extract_strided_slice %11 {offsets = [0, 1], sizes = [32, 258], strides = [1, 1]} : vector<32x260xbf16> to vector<32x258xbf16>
    %14 = vector.extract_strided_slice %11 {offsets = [0, 2], sizes = [32, 258], strides = [1, 1]} : vector<32x260xbf16> to vector<32x258xbf16>
    %15 = tpu.concatenate %12, %13, %14 in 0 : vector<32x258xbf16>, vector<32x258xbf16>, vector<32x258xbf16> -> vector<96x258xbf16>
    %cst = arith.constant dense<0.000000e+00> : vector<32x258xf32>
    %16 = tpu.matmul %0, %15, %cst {dimension_numbers = #tpu.dot_dimension_numbers<[1], [0], [0], [1], [0, 0, 1, 1], [], []>} : vector<32x96xbf16>, vector<96x258xbf16>, vector<32x258xf32> -> vector<32x258xf32>
    %17 = vector.broadcast %2 : vector<32x1xf32> to vector<32x258xf32>
    %18 = arith.addf %16, %17 : vector<32x258xf32>
    %cst_10 = arith.constant 0.000000e+00 : f32
    %19 = vector.broadcast %cst_10 : f32 to vector<32x258xf32>
    %20 = arith.maximumf %18, %19 : vector<32x258xf32>
    %cst_11 = arith.constant 0.000000e+00 : f32
    %21 = vector.broadcast %cst_11 : f32 to vector<32x258xf32>
    %22 = arith.select %9, %20, %21 : vector<32x258xi1>, vector<32x258xf32>
    %23 = arith.truncf %22 : vector<32x258xf32> to vector<32x258xbf16>
    %24 = vector.extract_strided_slice %23 {offsets = [0, 0], sizes = [32, 256], strides = [1, 1]} : vector<32x258xbf16> to vector<32x256xbf16>
    %25 = vector.extract_strided_slice %23 {offsets = [0, 1], sizes = [32, 256], strides = [1, 1]} : vector<32x258xbf16> to vector<32x256xbf16>
    %26 = vector.extract_strided_slice %23 {offsets = [0, 2], sizes = [32, 256], strides = [1, 1]} : vector<32x258xbf16> to vector<32x256xbf16>
    %27 = tpu.concatenate %24, %25, %26 in 0 : vector<32x256xbf16>, vector<32x256xbf16>, vector<32x256xbf16> -> vector<96x256xbf16>
    %cst_12 = arith.constant dense<0.000000e+00> : vector<32x256xf32>
    %28 = tpu.matmul %1, %27, %cst_12 {dimension_numbers = #tpu.dot_dimension_numbers<[1], [0], [0], [1], [0, 0, 1, 1], [], []>} : vector<32x96xbf16>, vector<96x256xbf16>, vector<32x256xf32> -> vector<32x256xf32>
    %29 = vector.extract_strided_slice %11 {offsets = [0, 2], sizes = [32, 256], strides = [1, 1]} : vector<32x260xbf16> to vector<32x256xbf16>
    %30 = arith.extf %29 : vector<32x256xbf16> to vector<32x256xf32>
    %31 = vector.broadcast %3 : vector<32x1xf32> to vector<32x256xf32>
    %32 = arith.addf %28, %31 : vector<32x256xf32>
    %33 = arith.addf %32, %30 : vector<32x256xf32>
    %cst_13 = arith.constant 0.000000e+00 : f32
    %34 = vector.broadcast %cst_13 : f32 to vector<32x256xf32>
    %35 = arith.maximumf %33, %34 : vector<32x256xf32>
    %c0_14 = arith.constant 0 : index
    %c0_15 = arith.constant 0 : index
    %c0_16 = arith.constant 0 : index
    %36 = vector.load %arg6[%c0_14, %c0_15, %c0_16] : memref<1x32x256xf32, #tpu.memory_space<vmem>>, vector<1x32x256xf32>
    %37 = vector.shape_cast %36 : vector<1x32x256xf32> to vector<32x256xf32>
    %38 = vector.shape_cast %35 : vector<32x256xf32> to vector<1x32x256xf32>
    tpu.vector_store %arg6[%c0_14, %c0_15, %c0_16], %38 {strides = array<i32>} : memref<1x32x256xf32, #tpu.memory_space<vmem>>, vector<1x32x256xf32>,
    return
  }
  func.func @transform_0(%arg0: i32) -> (i32, i32, i32) {
    %c0_i32 = arith.constant 0 : i32
    %c0_i32_0 = arith.constant 0 : i32
    %c0_i32_1 = arith.constant 0 : i32
    return %arg0, %c0_i32, %c0_i32_0 : i32, i32, i32
  }
  func.func @transform_1(%arg0: i32) -> (i32, i32) {
    %c0_i32 = arith.constant 0 : i32
    %c0_i32_0 = arith.constant 0 : i32
    %c0_i32_1 = arith.constant 0 : i32
    return %c0_i32, %c0_i32_0 : i32, i32
  }
  func.func @transform_2(%arg0: i32) -> (i32, i32) {
    %c0_i32 = arith.constant 0 : i32
    %c0_i32_0 = arith.constant 0 : i32
    %c0_i32_1 = arith.constant 0 : i32
    return %c0_i32, %c0_i32_0 : i32, i32
  }
  func.func @transform_3(%arg0: i32) -> (i32, i32) {
    %c0_i32 = arith.constant 0 : i32
    %c0_i32_0 = arith.constant 0 : i32
    %c0_i32_1 = arith.constant 0 : i32
    return %c0_i32, %c0_i32_0 : i32, i32
  }
  func.func @transform_4(%arg0: i32) -> (i32, i32) {
    %c0_i32 = arith.constant 0 : i32
    %c0_i32_0 = arith.constant 0 : i32
    %c0_i32_1 = arith.constant 0 : i32
    return %c0_i32, %c0_i32_0 : i32, i32
  }
  func.func @transform_5(%arg0: i32) -> (i32, i32, i32) {
    %c0_i32 = arith.constant 0 : i32
    %c0_i32_0 = arith.constant 0 : i32
    %c0_i32_1 = arith.constant 0 : i32
    return %arg0, %c0_i32, %c0_i32_0 : i32, i32, i32
  }
}

</mosaic_0001>

<bundles_post_ra>
// kernel: tpu_custom_call.1
= control target key start
LH: loop header
LB: loop body
LE: loop exit
PB: predicated region body
PF: predicated region fallthrough
CT: control target
= control target key end

     0   :  { %10 = vsyncpa [#allocation3], 0  ;;  %s1487_s0 = inlined_call_operand.hbm [shape: bf16[2,32,260], index: 0, kind: input, shape index: {}]   ;;  %s1488_s1 = inlined_call_operand.vmem [shape: bf16[32,96], index: 1, kind: input, shape index: {}]   ;;  %s1489_s2 = inlined_call_operand.vmem [shape: f32[32,1], index: 2, kind: input, shape index: {}]   ;;  %s1490_s3 = inlined_call_operand.vmem [shape: bf16[32,96], index: 3, kind: input, shape index: {}]   ;;  %s1491_s4 = inlined_call_operand.vmem [shape: f32[32,1], index: 4, kind: input, shape index: {}]   ;;  %s1492_s5 = inlined_call_operand.hbm [shape: f32[2,32,256], index: 5, kind: output, shape index: {}]  }
   0x1   :  { %12 = vsyncpa [#allocation3 + $0x1], 0 }
   0x2   :  { %13 = vsyncpa [#allocation4], 0 }
   0x3   :  { %15 = vsyncpa [#allocation4 + $0x1], 0  ;;  %s1128_s18 = smov 0   ;;  %s1130_s19 = smov 0  }
   0x4   :  { %s1132_s20 = smov 0   ;;  %s1134_s21 = smov 0  }
   0x5 LB: > { %s1149_s22 = sadd.s32 4294967295, %s1087_s21   ;;  %s839_s23 = sadd.s32 4294967294, %s1087_s21   ;;  %s1087_s21 = sphi %s1134_s21, %s1506_s21   ;;  %s1083_s20 = sphi %s1132_s20, %s1505_s20   ;;  %s1079_s19 = sphi %s1130_s19, %s1504_s19   ;;  %s1075_s18 = sphi %s1128_s18, %s1503_s18  }
   0x6   : > { %s1153_s24 = sadd.s32 1, %s1087_s21   ;;  %s28_s25 = sadd.s32 1, %s1083_s20 }
   0x7   : > { %s25_s26 = ssub.s32 %s1087_s21, %s1153_s24  ;;  %p35_p0 = scmp.ne.s32.totalorder %s1083_s20, %s1079_s19 }
   0x8   : > { %p26_p1 = scmp.eq.s32.totalorder %s25_s26, 0  ;;  %p36_p2 = scmp.eq.s32.totalorder %s1087_s21, 0 }
   0x9   : > { %p41_p3 = scmp.ne.s32.totalorder %s1079_s19, %s1075_s18  ;;  %p42_p4 = scmp.eq.s32.totalorder %s1149_s22, 0 }
   0xa   : > { %s1165_s27 = scalar_select %p26_p1, %s1083_s20, %s28_s25  }
   0xb   : > { %p37_p5 = por %p36_p2, %p35_p0  ;;  %p1167_p6 = por %p42_p4, %p41_p3 }
   0xc   : > { %p149_p7 = scmp.eq.s32.totalorder %s1149_s22, 1  ;;  %p155_p8 = scmp.eq.s32.totalorder %s839_s23, 1 }
   0xd   : > { %s1495_s28 = scalar_select %p1167_p6, 1, 0 }
   0xe   : > { %p912_p10 = scmp.lt.s32.totalorder %s1087_s21, 2  ;;  %p1174_p11 = por %p149_p7, %p35_p0 }
   0xf   : > { %p1178_p12 = por %p155_p8, %p41_p3  ;;  %s187_s6 = sand.u32 1, %s1083_s20  }
  0x10   : > { %s1496_s29 = scalar_select %p1174_p11, 1, 0 }
  0x11   : > { %s1497_s30 = scalar_select %p1178_p12, 1, 0 }
  0x12   : > { %s898_s7 = smul.u32 768, %s1087_s21  ;;  %p1189_p13 = pnand %p912_p10, %p37_p5 }
  0x13   : > { %s897_s8 = smul.u32 48, %s187_s6  ;;  %s1195_s15 = scalar_lea.sflag [#allocation3], %s187_s6 }
  0x14   : > { %s1187_s11 = scalar_lea.hbm %s1487_s0, %s898_s7  ;;  %p997_p1 = pneg %p1189_p13 }
  0x15   : > { %s191_s13 = scalar_lea.vmem [#allocation2], %s897_s8  ;;  %s995_s16 = scalar_lea.hbm %s1187_s11, 768 }
  0x16   : > { %s198_s14 = sshll.u32 %s191_s13, 4  ;;  %p996_p0 = scmp.ne.s32.totalorder %s1187_s11, %s995_s16  ;;  %s1193_s14 = int_to_ptr.vmem [resolvable:$true] %s198_s14 }
  0x17   : > { %s1000_s25 = scalar_lea.hbm %s1487_s0, 1536  ;;  %p1001_p4 = scmp.lt.s32.totalorder %s1187_s11, %s1487_s0 }
  0x18   : > { %p998_p2 = pnand %p997_p1, %p996_p0  ;;  %p1002_p5 = scmp.lt.s32.totalorder %s1000_s25, %s995_s16 }
  0x1a   : > { %p999_p3 = pneg %p998_p2  ;;  %p1003_p7 = por %p1002_p5, %p1001_p4 }
  0x1c   : > { %p1004_p8 = pnand %p1003_p7, %p999_p3 }
  0x1e   : > { %1007 = shalt.err (!%p1004_p8)
}
  0x1f   : > { %s1008_s6 = scalar_lea.vmem %s1193_s14, 768  ;;  %s1089_s8 = smov [#allocation2]  }
  0x20   : > { %p1009_p10 = scmp.ne.s32.totalorder %s1193_s14, %s1008_s6  ;;  %s1013_s9 = sshll.u32 %s1089_s8, 4  ;;  %s1014_s9 = int_to_ptr.vmem [resolvable:$false] %s1013_s9 }
  0x21   : > { %s1015_s10 = scalar_lea.vmem %s1014_s9, 1536  ;;  %p1016_p2 = scmp.lt.s32.totalorder %s1193_s14, %s1014_s9 }
  0x22   : > { %p1011_p9 = pnand %p1009_p10, %p997_p1  ;;  %p1017_p12 = scmp.lt.s32.totalorder %s1015_s10, %s1008_s6 }
  0x24   : > { %p1012_p0 = pneg %p1011_p9  ;;  %p1018_p11 = por %p1017_p12, %p1016_p2 }
  0x26   : > { %p1019_p6 = pnand %p1018_p11, %p1012_p0 }
  0x28   : > { %1022 = shalt.err (!%p1019_p6)
}
  0x29   : > { %s1090_s13 = smov 192   ;;  %s1091_s16 = smov 12  }
  0x2a   : > { %907 = dma.hbm_to_vmem [thread:$0]  (!%p1189_p13), %s1187_s11, 768, %s1193_s14, %s1195_s15, %s1090_s13, %s1090_s13, %s1091_s16  }
  0x2b   : > { %p843_p9 = scmp.ge.s32.totalorder %s1087_s21, 1  ;;  %p206_p1 = scmp.lt.s32.totalorder %s1087_s21, 3 }
  0x2d   : > { %p207_p3 = pnand %p843_p9, %p206_p1 }
  0x2e   : > { %s1219_s17 = sand.u32 (!%p207_p3), 1, %s1079_s19   ;;  %p1499_p6 = scmp.ne.s32.totalorder (!%p207_p3), %s1495_s28, 0 }
  0x2f   : > { %210 = sbr.rel (%p207_p3) target bundleno = 802 (0x322), region = 40  ;;  %s213_s25 = scalar_lea.sflag (!%p207_p3), [#allocation3], %s1219_s17 }
  0x30   : > { %s899_s23 = smul.u32 (!%p207_p3), 48, %s1219_s17 }
  0x32   : > { %s216_s26 = scalar_lea.vmem (!%p207_p3), [#allocation2], %s899_s23 }
  0x34   : > { %1066 = dma.done.wait (%p1499_p6), %s213_s25, 768  }
  0x35   : > { %1068 = vsyncadd (%p1499_p6), %s213_s25, 4294966528  ;;  %v1227_v0 = vld [vmem:[%s216_s26 + $0x18] sm:$0xff]  ;;  %v1229_v1 = vld [vmem:[%s216_s26 + $0x24] sm:$0xff]  ;;  %s1092_s28 = smov 126   ;;  %s1093_s11 = smov 127   ;;  %v1094_v14 = vmov 0   ;;  %v260_v51 = vlaneseq }
  0x36   : > { %v1231_v2 = vld [vmem:[%s216_s26 + $0x20] sm:$0xf]  ;;  %v1235_v3 = vcombine.high %v1227_v0, %v1229_v1  ;;  %v1239_v4 = vcombine.low %v1227_v0, %v1229_v1  ;;  %v1241_v5 = vld [vmem:[%s216_s26 + $0x2c] sm:$0xf]  ;;  %v1247_v8 = vld [vmem:[%s216_s26 + $0x8] sm:$0xf]  ;;  %428 = vmatprep.mubr.bf16.mxu1 %v1094_v14  ;;  %954 = vset.pattern.permute.xlu1 %v1094_v14 }
  0x37   : > { %v1243_v6 = vld [vmem:[%s216_s26] sm:$0xff]  ;;  %v1245_v7 = vld [vmem:[%s216_s26 + $0xc] sm:$0xff]  ;;  %v1249_v9 = vld [vmem:[%s216_s26 + $0x14] sm:$0xf]  ;;  %v1257_v10 = vcombine.low %v1231_v2, %v1241_v5  ;;  %953 = vset.pattern.permute.xlu0 %v1094_v14  ;;  %654 = vmatprep.mubr.bf16.mxu0 %v1094_v14  ;;  %vm348_vm0 = vcmask 1031168   ;;  %vm325_vm1 = vcmask 1039360  }
  0x38   : > { %344 = vrot.lane.b32.xlu0 %v1235_v3, %s1092_s28  ;;  %342 = vrot.lane.b32.xlu1 %v1239_v4, %s1092_s28  ;;  %v846_v11 = vcombine.high %v1243_v6, %v1245_v7  ;;  %v1266_v12 = vcombine.low %v1247_v8, %v1249_v9  ;;  %v845_v13 = vcombine.low %v1243_v6, %v1245_v7  ;;  %v255_v15 = vld [vmem:[%s1489_s2 + $0x18] sm:$0xff]  ;;  %v254_v16 = vld [vmem:[%s1489_s2 + $0x10] sm:$0xff]  ;;  %vm389_vm2 = vcmask 785408   ;;  %s844_s16 = sshll.u32 %s1219_s17, 6  ;;  %s872_s26 = sshll.u32 %s1149_s22, 10 }
  0x39   : > { %v252_v17 = vld [vmem:[%s1489_s2] sm:$0xff]  ;;  %v253_v18 = vld [vmem:[%s1489_s2 + $0x8] sm:$0xff]  ;;  %v1326_v61 = vand.u32 127, %v260_v51  ;;  %v576_v51 = vunpack.c.l.bf16 %v1247_v8  ;;  %v583_v8 = vunpack.c.l.bf16 %v1229_v1  ;;  %s1421_s23 = scalar_lea.vmem [#allocation5], %s844_s16  ;;  %s1442_s15 = scalar_lea.hbm %s1492_s5, %s872_s26 }
  0x3a   : > { %v991_v39 = vld [vmem:[%s1488_s1] sm:$0xff]   ;;  %v992_v40 = vld [vmem:[%s1488_s1 + $0x8] sm:$0xff]   ;;  %s766_s25 = sshll.u32 %s1421_s23, 4  ;;  %s753_s7 = scalar_lea.sflag [#allocation4], %s1219_s17  ;;  %s1436_s25 = int_to_ptr.vmem [resolvable:$true] %s766_s25 }
  0x3b   : > { %vm264_vm3 = vcmp.ge.s32.totalorder %v1326_v61, 1  ;;  %s1023_s6 = scalar_lea.vmem %s1436_s25, 1024  ;;  %p1500_p12 = scmp.ne.s32.totalorder %s1496_s29, 0 }
  0x3c   : > { %346 = vrot.lane.b32.xlu0 %v1257_v10, %s1092_s28  ;;  %338 = vrot.lane.b32.xlu1 %v846_v11, %s1092_s28  ;;  %vm859_vm5 = vmpackc.low %vm264_vm3, %vm264_vm3  ;;  %p1024_p11 = scmp.ne.s32.totalorder %s1436_s25, %s1023_s6  ;;  %s1095_s22 = smov [#allocation5]  }
  0x3d   : > { %s1027_s8 = sshll.u32 %s1095_s22, 4  ;;  %s1028_s8 = int_to_ptr.vmem [resolvable:$false] %s1027_s8 }
  0x3e   : > { %p1025_p13 = pnand %p1024_p11, %p1500_p12  ;;  %s1029_s9 = scalar_lea.vmem %s1028_s8, 2048 }
  0x3f   : > { %p1030_p5 = scmp.lt.s32.totalorder %s1436_s25, %s1028_s8  ;;  %p1031_p7 = scmp.lt.s32.totalorder %s1029_s9, %s1023_s6 }
  0x40   : > { %340 = vrot.lane.b32.xlu0 %v1266_v12, %s1092_s28  ;;  %336 = vrot.lane.b32.xlu1 %v845_v13, %s1092_s28  ;;  %p1026_p4 = pneg %p1025_p13 }
  0x41   : > { %p1032_p8 = por %p1031_p7, %p1030_p5 }
  0x43   : > { %p1033_p10 = pnand %p1032_p8, %p1026_p4 }
  0x44   : > { %321 = vrot.lane.b32.xlu0 %v1235_v3, %s1093_s11  ;;  %323 = vrot.lane.b32.xlu1 %v1257_v10, %s1093_s11 }
  0x48   : > { %319 = vrot.lane.b32.xlu0 %v1239_v4, %s1093_s11  ;;  %315 = vrot.lane.b32.xlu1 %v846_v11, %s1093_s11 }
  0x4c   : > { %317 = vrot.lane.b32.xlu0 %v1266_v12, %s1093_s11  ;;  %313 = vrot.lane.b32.xlu1 %v845_v13, %s1093_s11 }
  0x50   : > { %376 = vperm.xlu1 %954, %v255_v15   ;;  %371 = vperm.xlu0 %953, %v254_v16  }
  0x54   : > { %361 = vperm.xlu1 %954, %v252_v17   ;;  %366 = vperm.xlu0 %953, %v253_v18  }
  0xaa   : > { %v345_v19 = vpop.permute.xlu0 %344  ;;  %v343_v20 = vpop.permute.xlu1 %342 }
  0xab   : > { %v351_v24 = vsel %vm348_vm0, %v343_v20, %v345_v19 }
  0xae   : > { %v347_v21 = vpop.permute.xlu0 %346  ;;  %v339_v22 = vpop.permute.xlu1 %338 }
  0xaf   : > { %v352_v23 = vsel %vm348_vm0, %v345_v19, %v347_v21 }
  0xb0   : > { %400 = vmatprep.subr.bf16.mxu1 %v352_v23 }
  0xb1   : > { %401 = vmatpush1.bf16.msra.mxu1 %v351_v24 }
  0xb2   : > { %v341_v25 = vpop.permute.xlu0 %340  ;;  %v337_v26 = vpop.permute.xlu1 %336 }
  0xb3   : > { %v350_v27 = vsel %vm348_vm0, %v339_v22, %v341_v25  ;;  %v349_v28 = vsel %vm348_vm0, %v337_v26, %v339_v22 }
  0xb4   : > { %402 = vmatprep.subr.bf16.mxu1 %v350_v27 }
  0xb5   : > { %403 = vmatpush1.bf16.msra.mxu1 %v349_v28 }
  0xb6   : > { %v322_v29 = vpop.permute.xlu0 %321  ;;  %v324_v30 = vpop.permute.xlu1 %323 }
  0xb7   : > { %v329_v31 = vsel %vm325_vm1, %v322_v29, %v324_v30 }
  0xb8   : > { %404 = vmatprep.subr.bf16.mxu1 %v329_v31 }
  0xba   : > { %v320_v32 = vpop.permute.xlu0 %319  ;;  %v316_v33 = vpop.permute.xlu1 %315 }
  0xbb   : > { %v328_v34 = vsel %vm325_vm1, %v320_v32, %v322_v29 }
  0xbc   : > { %405 = vmatpush1.bf16.msra.mxu1 %v328_v34 }
  0xbe   : > { %v318_v35 = vpop.permute.xlu0 %317  ;;  %v314_v36 = vpop.permute.xlu1 %313 }
  0xbf   : > { %v327_v37 = vsel %vm325_vm1, %v316_v33, %v318_v35  ;;  %v326_v38 = vsel %vm325_vm1, %v314_v36, %v316_v33 }
  0xc0   : > { %406 = vmatprep.subr.bf16.mxu1 %v327_v37 }
  0xc1   : > { %407 = vmatpush1.bf16.msra.mxu1 %v326_v38 }
  0xc2   : > { %408 = vmatprep.subr.bf16.mxu1 %v1235_v3 }
  0xc5   : > { %409 = vmatpush1.bf16.msra.mxu1 %v1239_v4 }
  0xc6   : > { %410 = vmatprep.subr.bf16.mxu1 %v846_v11 }
  0xc9   : > { %411 = vmatpush1.bf16.msra.mxu1 %v845_v13 }
  0xca   : > { %881 = vmatprep.subr.bf16.mxu1 %v347_v21 }
  0xcb   : > { %v377_v41 = vpop.permute.xlu1 %376  ;;  %v372_v42 = vpop.permute.xlu0 %371 }
  0xcc   : > { %853 = vmatmul.mubr.msk.bf16.vlgmr.msra.gmra.mxu1 %vm389_vm2, %v991_v39 }
  0xcd   : > { %882 = vmatpush3.bf16.msra.mxu1 %v347_v21  ;;  %438 = vmatprep.mubr.bf16.mxu1 %v1094_v14 }
  0xce   : > { %883 = vmatprep.subr.bf16.mxu1 %v341_v25 }
  0xcf   : > { %v362_v44 = vpop.permute.xlu1 %361  ;;  %v367_v46 = vpop.permute.xlu0 %366 }
  0xd1   : > { %884 = vmatpush3.bf16.msra.mxu1 %v341_v25  ;;  %v263_v25 = vadd.s32 256, %v1326_v61  ;;  %v994_v61 = vld [vmem:[%s1490_s3 + $0x8] sm:$0xff]  }
  0xd2   : > { %885 = vmatprep.subr.bf16.mxu1 %v324_v30 }
  0xd3   : > { %vm269_vm4 = vcmp.le.s32.totalorder %v263_v25, 256 }
  0xd4   : > { %854 = vmatmul.mubr.msk.bf16.gmra.mxu1 %vm389_vm2, %v992_v40 }
  0xd5   : > { %886 = vmatpush3.bf16.msra.mxu1 %v324_v30  ;;  %893 = vmatprep.mubr.msk.bf16.mxu1 %vm389_vm2, %v991_v39 }
  0xd6   : > { %887 = vmatprep.subr.bf16.mxu1 %v318_v35 }
  0xd9   : > { %888 = vmatpush3.bf16.msra.mxu1 %v318_v35 }
  0xda   : > { %889 = vmatprep.subr.bf16.mxu1 %v1257_v10 }
  0xdd   : > { %890 = vmatpush3.bf16.msra.mxu1 %v1257_v10 }
  0xde   : > { %891 = vmatprep.subr.bf16.mxu1 %v1266_v12 }
  0xe1   : > { %892 = vmatpush3.bf16.msra.mxu1 %v1266_v12 }
  0xe4   : > { %894 = vmatmul.mubr.msk.bf16.vlgmr.msra.gmra.mxu1 %vm389_vm2, %v992_v40 }
 0x18c   : > { %v430_v43 = vpop.f32.mrf.mxu1 }
 0x18d   : > { %v431_v47 = vadd.f32 %v430_v43, %v362_v44 }
 0x18e   : > { %v432_v45 = vpop.f32.mrf.mxu1 }
 0x18f   : > { %v433_v49 = vadd.f32 %v432_v45, %v362_v44  ;;  %v498_v53 = vmax.f32 %v431_v47, 0.0  ;;  %v256_v45 = vld [vmem:[%s1491_s4] sm:$0xff]  ;;  %v257_v47 = vld [vmem:[%s1491_s4 + $0x8] sm:$0xff] }
 0x190   : > { %v434_v48 = vpop.f32.mrf.mxu1 }
 0x191   : > { %v435_v50 = vadd.f32 %v434_v48, %v367_v46  ;;  %v499_v57 = vmax.f32 %v433_v49, 0.0  ;;  %v259_v48 = vld [vmem:[%s1491_s4 + $0x18] sm:$0xff]  ;;  %v574_v49 = vunpack.c.l.bf16 %v1243_v6 }
 0x192   : > { %v436_v52 = vpop.f32.mrf.mxu1 }
 0x193   : > { %v501_v54 = vmax.f32 %v435_v50, 0.0  ;;  %v437_v55 = vadd.f32 %v436_v52, %v367_v46  ;;  %v575_v50 = vunpack.c.h.bf16 %v1243_v6  ;;  %v577_v52 = vunpack.c.l.bf16 %v1245_v7 }
 0x194   : > { %v440_v56 = vpop.f32.mrf.mxu1  ;;  %v582_v6 = vunpack.c.l.bf16 %v1231_v2 }
 0x195   : > { %v1324_v58 = vpack.c.bf16 %v501_v54, %v498_v53  ;;  %v502_v59 = vmax.f32 %v437_v55, 0.0  ;;  %v441_v60 = vadd.f32 %v440_v56, %v372_v42  ;;  %v513_v39 = vsel %vm264_vm3, %v501_v54, 0.0 }
 0x196   : > { %v442_v62 = vpop.f32.mrf.mxu1  ;;  %v579_v54 = vunpack.c.l.bf16 %v1249_v9  ;;  %v580_v55 = vunpack.c.l.bf16 %v1227_v0  ;;  %v581_v56 = vunpack.c.h.bf16 %v1227_v0  ;;  %v585_v9 = vunpack.c.l.bf16 %v1241_v5 }
 0x197   : > { %v1328_v63 = vpack.c.bf16 %v502_v59, %v499_v57  ;;  %v504_v3 = vmax.f32 %v441_v60, 0.0  ;;  %v443_v4 = vadd.f32 %v442_v62, %v372_v42  ;;  %v955_v57 = vpack.i.bf16 %v575_v50, %v574_v49 }
 0x198   : > { %v444_v10 = vpop.f32.mrf.mxu1  ;;  %v960_v59 = vpack.i.bf16 %v577_v52, %v576_v51  ;;  %v970_v62 = vpack.i.bf16 %v581_v56, %v580_v55 }
 0x199   : > { %v445_v11 = vadd.f32 %v444_v10, %v377_v41  ;;  %556 = vrot.lane.b32.xlu0 %v1328_v63, %s1092_s28  ;;  %v516_v13 = vsel %vm264_vm3, %v504_v3, 0.0  ;;  %v505_v17 = vmax.f32 %v443_v4, 0.0 }
 0x19a   : > { %v446_v12 = vpop.f32.mrf.mxu1 }
 0x19b   : > { %v507_v15 = vmax.f32 %v445_v11, 0.0  ;;  %v447_v16 = vadd.f32 %v446_v12, %v377_v41 }
 0x19d   : > { %v519_v18 = vsel %vm264_vm3, %v507_v15, 0.0  ;;  %v1337_v19 = vpack.c.bf16 %v507_v15, %v504_v3  ;;  %v508_v20 = vmax.f32 %v447_v16, 0.0  ;;  %v975_v3 = vpack.i.bf16 %v583_v8, %v582_v6 }
 0x19e   : > { %v525_v21 = vpack.c.bf16 %v519_v18, %v516_v13 }
 0x19f   : > { %v1339_v22 = vpack.c.bf16 %v508_v20, %v505_v17 }
 0x1a0   : > { %560 = vrot.lane.b32.xlu1 %v525_v21, %s1092_s28 }
 0x1a4   : > { %v895_v23 = vpop.f32.mrf.mxu1  ;;  %562 = vrot.lane.b32.xlu1 %v1339_v22, %s1092_s28 }
 0x1a5   : > { %v492_v24 = vadd.f32 %v895_v23, %v372_v42 }
 0x1a6   : > { %v483_v26 = vpop.f32.mrf.mxu1 }
 0x1a7   : > { %v484_v27 = vadd.f32 %v483_v26, %v362_v44  ;;  %v506_v29 = vmax.f32 %v492_v24, 0.0 }
 0x1a8   : > { %v896_v28 = vpop.f32.mrf.mxu1  ;;  %542 = vrot.lane.b32.xlu1 %v1339_v22, %s1093_s11 }
 0x1a9   : > { %v495_v30 = vadd.f32 %v896_v28, %v377_v41  ;;  %v500_v32 = vmax.f32 %v484_v27, 0.0  ;;  %v518_v35 = vsel %vm269_vm4, %v506_v29, 0.0  ;;  %v510_v41 = vsel %vm264_vm3, %v498_v53, 0.0  ;;  %v993_v29 = vld [vmem:[%s1490_s3] sm:$0xff]  }
 0x1aa   : > { %v486_v31 = vpop.f32.mrf.mxu1  ;;  %v522_v44 = vpack.c.bf16 %v513_v39, %v510_v41  ;;  %v578_v53 = vunpack.c.h.bf16 %v1245_v7  ;;  %v584_v7 = vunpack.c.h.bf16 %v1229_v1 }
 0x1ab   : > { %v509_v33 = vmax.f32 %v495_v30, 0.0  ;;  %v487_v34 = vadd.f32 %v486_v31, %v367_v46  ;;  %v512_v40 = vsel %vm269_vm4, %v500_v32, 0.0  ;;  %v258_v46 = vld [vmem:[%s1491_s4 + $0x10] sm:$0xff] }
 0x1ac   : > { %v965_v60 = vpack.i.bf16 %v579_v54, %v578_v53  ;;  %v980_v0 = vpack.i.bf16 %v585_v9, %v584_v7 }
 0x1ad   : > { %v521_v36 = vsel %vm269_vm4, %v509_v33, 0.0  ;;  %v503_v37 = vmax.f32 %v487_v34, 0.0 }
 0x1ae   : > { %v527_v38 = vpack.c.bf16 %v521_v36, %v518_v35 }
 0x1af   : > { %v515_v42 = vsel %vm269_vm4, %v503_v37, 0.0 }
 0x1b0   : > { %564 = vrot.lane.b32.xlu0 %v527_v38, %s1092_s28  ;;  %v524_v43 = vpack.c.bf16 %v515_v42, %v512_v40 }
 0x1b2   : > { %558 = vrot.lane.b32.xlu1 %v524_v43, %s1092_s28 }
 0x1b4   : > { %554 = vrot.lane.b32.xlu0 %v522_v44, %s1092_s28 }
 0x1b6   : > { %540 = vrot.lane.b32.xlu1 %v525_v21, %s1093_s11 }
 0x1b8   : > { %544 = vrot.lane.b32.xlu0 %v527_v38, %s1093_s11 }
 0x1ba   : > { %538 = vrot.lane.b32.xlu1 %v524_v43, %s1093_s11 }
 0x1bc   : > { %536 = vrot.lane.b32.xlu0 %v1328_v63, %s1093_s11 }
 0x1be   : > { %588 = vperm.xlu1 %954, %v256_v45  }
 0x1c0   : > { %534 = vrot.lane.b32.xlu0 %v522_v44, %s1093_s11 }
 0x1c2   : > { %598 = vperm.xlu1 %954, %v258_v46  }
 0x1c4   : > { %593 = vperm.xlu0 %953, %v257_v47  }
 0x1c6   : > { %956 = vrot.lane.b32.xlu1 %v955_v57, %s1092_s28 }
 0x1c8   : > { %603 = vperm.xlu0 %953, %v259_v48  }
 0x1ca   : > { %966 = vrot.lane.b32.xlu1 %v965_v60, %s1092_s28 }
 0x1cc   : > { %961 = vrot.lane.b32.xlu0 %v960_v59, %s1092_s28 }
 0x1ce   : > { %976 = vrot.lane.b32.xlu1 %v975_v3, %s1092_s28 }
 0x1d0   : > { %971 = vrot.lane.b32.xlu0 %v970_v62, %s1092_s28 }
 0x1d4   : > { %981 = vrot.lane.b32.xlu0 %v980_v0, %s1092_s28 }
 0x20b   : > { %v557_v10 = vpop.permute.xlu0 %556 }
 0x212   : > { %v561_v2 = vpop.permute.xlu1 %560 }
 0x216   : > { %v563_v4 = vpop.permute.xlu1 %562 }
 0x217   : > { %v568_v5 = vsel %vm348_vm0, %v561_v2, %v563_v4 }
 0x21a   : > { %v543_v11 = vpop.permute.xlu1 %542 }
 0x222   : > { %v565_v12 = vpop.permute.xlu0 %564 }
 0x223   : > { %v569_v13 = vsel %vm348_vm0, %v563_v4, %v565_v12 }
 0x224   : > { %v559_v1 = vpop.permute.xlu1 %558  ;;  %626 = vmatprep.subr.bf16.mxu0 %v569_v13 }
 0x225   : > { %627 = vmatpush1.bf16.msra.mxu0 %v568_v5  ;;  %v567_v15 = vsel %vm348_vm0, %v557_v10, %v559_v1 }
 0x226   : > { %628 = vmatprep.subr.bf16.mxu0 %v567_v15  ;;  %v555_v16 = vpop.permute.xlu0 %554 }
 0x227   : > { %v566_v17 = vsel %vm348_vm0, %v555_v16, %v557_v10 }
 0x228   : > { %v541_v18 = vpop.permute.xlu1 %540 }
 0x229   : > { %629 = vmatpush1.bf16.msra.mxu0 %v566_v17  ;;  %v548_v23 = vsel %vm325_vm1, %v541_v18, %v543_v11 }
 0x22a   : > { %v545_v20 = vpop.permute.xlu0 %544 }
 0x22b   : > { %v549_v21 = vsel %vm325_vm1, %v543_v11, %v545_v20 }
 0x22c   : > { %630 = vmatprep.subr.bf16.mxu0 %v549_v21  ;;  %v539_v24 = vpop.permute.xlu1 %538 }
 0x22d   : > { %631 = vmatpush1.bf16.msra.mxu0 %v548_v23 }
 0x22e   : > { %v537_v25 = vpop.permute.xlu0 %536 }
 0x22f   : > { %v547_v26 = vsel %vm325_vm1, %v537_v25, %v539_v24 }
 0x230   : > { %632 = vmatprep.subr.bf16.mxu0 %v547_v26 }
 0x232   : > { %v535_v27 = vpop.permute.xlu0 %534 }
 0x233   : > { %v546_v28 = vsel %vm325_vm1, %v535_v27, %v537_v25 }
 0x234   : > { %633 = vmatpush1.bf16.msra.mxu0 %v546_v28 }
 0x235   : > { %634 = vmatprep.subr.bf16.mxu0 %v1339_v22 }
 0x238   : > { %861 = vmatpush1.bf16.msk.msra.mxu0 %vm859_vm5, %v1337_v19 }
 0x239   : > { %636 = vmatprep.subr.bf16.mxu0 %v1328_v63  ;;  %v589_v19 = vpop.permute.xlu1 %588 }
 0x23c   : > { %864 = vmatpush1.bf16.msk.msra.mxu0 %vm859_vm5, %v1324_v58 }
 0x23d   : > { %v599_v63 = vpop.permute.xlu1 %598 }
 0x23f   : > { %865 = vmatmul.mubr.msk.bf16.vlgmr.msra.gmra.mxu0 %vm389_vm2, %v993_v29  ;;  %v594_v22 = vpop.permute.xlu0 %593 }
 0x240   : > { %664 = vmatprep.mubr.bf16.mxu0 %v1094_v14 }
 0x241   : > { %v957_v31 = vpop.permute.xlu1 %956 }
 0x242   : > { %v959_v33 = vunpack.i.h.bf16 %v957_v31  ;;  %v958_v58 = vunpack.i.l.bf16 %v957_v31 }
 0x243   : > { %v1414_v30 = vpop.permute.xlu0 %603 }
 0x244   : > { %v712_v37 = vsel %vm348_vm0, %v958_v58, %v959_v33 }
 0x245   : > { %v967_v34 = vpop.permute.xlu1 %966 }
 0x246   : > { %v968_v39 = vunpack.i.l.bf16 %v967_v34  ;;  %v969_v41 = vunpack.i.h.bf16 %v967_v34 }
 0x247   : > { %866 = vmatmul.mubr.msk.bf16.gmra.mxu0 %vm389_vm2, %v994_v61  ;;  %v962_v32 = vpop.permute.xlu0 %961 }
 0x248   : > { %v963_v35 = vunpack.i.l.bf16 %v962_v32  ;;  %v964_v38 = vunpack.i.h.bf16 %v962_v32  ;;  %v715_v56 = vsel %vm348_vm0, %v968_v39, %v969_v41 }
 0x249   : > { %v977_v46 = vpop.permute.xlu1 %976 }
 0x24a   : > { %v713_v43 = vsel %vm348_vm0, %v959_v33, %v963_v35  ;;  %v714_v48 = vsel %vm348_vm0, %v964_v38, %v968_v39  ;;  %v978_v57 = vunpack.i.l.bf16 %v977_v46  ;;  %v979_v7 = vunpack.i.h.bf16 %v977_v46 }
 0x24b   : > { %v972_v36 = vpop.permute.xlu0 %971 }
 0x24c   : > { %v974_v49 = vunpack.i.h.bf16 %v972_v36  ;;  %v973_v50 = vunpack.i.l.bf16 %v972_v36 }
 0x24e   : > { %v716_v62 = vsel %vm348_vm0, %v973_v50, %v974_v49  ;;  %v717_v10 = vsel %vm348_vm0, %v974_v49, %v978_v57 }
 0x24f   : > { %v982_v54 = vpop.permute.xlu0 %981 }
 0x250   : > { %v983_v9 = vunpack.i.l.bf16 %v982_v54  ;;  %v984_v11 = vunpack.i.h.bf16 %v982_v54 }
 0x252   : > { %v718_v15 = vsel %vm348_vm0, %v979_v7, %v983_v9  ;;  %v719_v21 = vsel %vm348_vm0, %v983_v9, %v984_v11 }
 0x2ff   : > { %v656_v14 = vpop.f32.mrf.mxu0 }
 0x300   : > { %v657_v40 = vadd.f32 %v656_v14, %v589_v19 }
 0x301   : > { %v658_v42 = vpop.f32.mrf.mxu0 }
 0x302   : > { %v728_v44 = vadd.f32 %v712_v37, %v657_v40  ;;  %v659_v45 = vadd.f32 %v658_v42, %v589_v19 }
 0x303   : > { %v660_v47 = vpop.f32.mrf.mxu0 }
 0x304   : > { %v736_v51 = vmax.f32 %v728_v44, 0.0  ;;  %v729_v52 = vadd.f32 %v713_v43, %v659_v45  ;;  %v661_v53 = vadd.f32 %v660_v47, %v594_v22 }
 0x305   : > { %v662_v55 = vpop.f32.mrf.mxu0 }
 0x306   : > { %744 = vst [vmem:[%s1421_s23] sm:$0xff] %v736_v51  ;;  %v737_v59 = vmax.f32 %v729_v52, 0.0  ;;  %v730_v60 = vadd.f32 %v714_v48, %v661_v53  ;;  %v663_v6 = vadd.f32 %v662_v55, %v594_v22 }
 0x307   : > { %v666_v8 = vpop.f32.mrf.mxu0 }
 0x308   : > { %745 = vst [vmem:[%s1421_s23 + $0x8] sm:$0xff] %v737_v59  ;;  %v738_v3 = vmax.f32 %v730_v60, 0.0  ;;  %v731_v0 = vadd.f32 %v715_v56, %v663_v6  ;;  %v667_v2 = vadd.f32 %v666_v8, %v599_v63 }
 0x309   : > { %v668_v4 = vpop.f32.mrf.mxu0 }
 0x30a   : > { %746 = vst [vmem:[%s1421_s23 + $0x10] sm:$0xff] %v738_v3  ;;  %v739_v12 = vmax.f32 %v731_v0, 0.0  ;;  %v732_v13 = vadd.f32 %v716_v62, %v667_v2  ;;  %v669_v1 = vadd.f32 %v668_v4, %v599_v63 }
 0x30b   : > { %v670_v5 = vpop.f32.mrf.mxu0 }
 0x30c   : > { %747 = vst [vmem:[%s1421_s23 + $0x18] sm:$0xff] %v739_v12  ;;  %v740_v16 = vmax.f32 %v732_v13, 0.0  ;;  %v733_v17 = vadd.f32 %v717_v10, %v669_v1  ;;  %v671_v18 = vadd.f32 %v670_v5, %v1414_v30 }
 0x30d   : > { %v672_v20 = vpop.f32.mrf.mxu0 }
 0x30e   : > { %748 = vst [vmem:[%s1421_s23 + $0x20] sm:$0xff] %v740_v16  ;;  %v741_v23 = vmax.f32 %v733_v17, 0.0  ;;  %v734_v24 = vadd.f32 %v718_v15, %v671_v18  ;;  %v673_v25 = vadd.f32 %v672_v20, %v1414_v30 }
 0x310   : > { %749 = vst [vmem:[%s1421_s23 + $0x28] sm:$0xff] %v741_v23  ;;  %v742_v26 = vmax.f32 %v734_v24, 0.0  ;;  %v735_v27 = vadd.f32 %v719_v21, %v673_v25 }
 0x312   : > { %750 = vst [vmem:[%s1421_s23 + $0x30] sm:$0xff] %v742_v26  ;;  %v743_v28 = vmax.f32 %v735_v27, 0.0 }
 0x314   : > { %751 = vst [vmem:[%s1421_s23 + $0x38] sm:$0xff] %v743_v28 }
 0x315   : > { %1036 = shalt.err (!%p1033_p10)
}
 0x316   : > { %s1037_s28 = scalar_lea.hbm %s1442_s15, 1024  ;;  %s1041_s13 = scalar_lea.hbm %s1492_s5, 2048 }
 0x317   : > { %p1038_p0 = scmp.ne.s32.totalorder %s1442_s15, %s1037_s28  ;;  %p1042_p1 = scmp.lt.s32.totalorder %s1442_s15, %s1492_s5 }
 0x318   : > { %p1043_p3 = scmp.lt.s32.totalorder %s1041_s13, %s1037_s28 }
 0x319   : > { %p1039_p2 = pnand %p1038_p0, %p1500_p12 }
 0x31a   : > { %p1044_p6 = por %p1043_p3, %p1042_p1 }
 0x31b   : > { %p1040_p9 = pneg %p1039_p2 }
 0x31d   : > { %p1045_p11 = pnand %p1044_p6, %p1040_p9 }
 0x31f   : > { %1048 = shalt.err (!%p1045_p11)
}
 0x320   : > { %s1096_s26 = smov 256   ;;  %s1097_s12 = smov 16  }
 0x321   : > { %902 = dma.vmem_to_hbm [thread:$0]  (%p1500_p12), %s1436_s25, 1024, %s1442_s15, %s753_s7, %s1096_s26, %s1096_s26, %s1097_s12  }
 0x322 PF: > { %s781_s14 = sand.u32 1, %s1075_s18   ;;  %p1501_p13 = scmp.ne.s32.totalorder %s1497_s30, 0 }
 0x323   : > { %p1502_p4 = scmp.ge.s32.totalorder %s1087_s21, 2  ;;  %s782_s6 = scalar_lea.sflag [#allocation4], %s781_s14 }
 0x325   : > { %p909_p5 = pnand %p1502_p4, %p1501_p13 }
 0x327   : > { %p910_p7 = pneg %p909_p5 }
 0x329   : > { %1070 = dma.done.wait (%p910_p7), %s782_s6, 1024  }
 0x32a   : > { %1072 = vsyncadd (%p910_p7), %s782_s6, 4294966272  ;;  %p18_p8 = scmp.ge.s32.totalorder %s1153_s24, 4   ;;  %s1503_s18 = smov %s1079_s19 }
 0x32b   : > { %s1504_s19 = smov %s1083_s20  ;;  %s1505_s20 = smov %s1165_s27 }
 0x32c   : > { %s1506_s21 = smov %s1153_s24  ;;  %20 = sbr.rel (!%p18_p8) target bundleno = 5 (0x5), region = 85 }
 0x331   :  { %787 = vsyncpa [#allocation3], 1 }
 0x332   :  { %789 = vsyncpa [#allocation3 + $0x1], 1 }
 0x333   :  { %790 = vsyncpa [#allocation4], 1 }
 0x334   :  { %792 = vsyncpa [#allocation4 + $0x1], 1 }

</bundles_post_ra>
